<compile_context>
chip_gen: v5e
topology: v5e:2x2
jax: 0.10.0
libtpu: 0.0.40
codegen_flags: <defaults>
</compile_context>

<pallas_src>
import functools

import jax
import jax.numpy as jnp
from jax.experimental import pallas as pl
from jax.experimental.pallas import tpu as pltpu


def _round_up(a, m):
    return ((a + m - 1) // m) * m


# ----------------------------------------------------------------------------
# Trace-time glue: quantize -> map to 2-bit -> pack 4 vals/byte -> unpack, but
# only the non-zero "head" columns (4*ceil(in_f/4)) of the reference's
# (out_f, out_f*in_f*4) matrix.  Vectorized JAX, run ONCE in prepare_qlinear.
# ----------------------------------------------------------------------------
def _quantize_pack_unpack_head(weight):
    out_f, in_f = weight.shape
    gamma = jnp.mean(jnp.abs(weight)) + 1e-5
    q = jnp.clip(jnp.round(weight / gamma), -1.0, 1.0)          # {-1, 0, 1}
    mapped = (q + 1.0).astype(jnp.uint8)                        # {0, 1, 2}

    pad = (-in_f) % 4
    mp = jnp.pad(mapped, ((0, 0), (0, pad)))                    # pack pads tail group with 0 bits
    g = mp.reshape(out_f, -1, 4)
    packed = (g[..., 0] << 6) | (g[..., 1] << 4) | (g[..., 2] << 2) | g[..., 3]

    shifts = jnp.array([6, 4, 2, 0], dtype=jnp.uint8)
    vals = (packed[..., None] >> shifts) & 3                    # (out_f, ceil(in_f/4), 4)
    # value - 1: padded slots decode to -1, exactly matching torch unpack_weights
    return (vals.astype(jnp.int8) - 1).reshape(out_f, -1)       # (out_f, 4*ceil(in_f/4)) int8


# ----------------------------------------------------------------------------
# Pallas kernel: out[b, j] = sum_i x[b, i] * W[i, j] + bias[j]
# Head column tiles do the contraction; tail tiles (structurally zero weight)
# just write the broadcast bias row.
# ----------------------------------------------------------------------------
def _qlinear_kernel(x_ref, w_ref, b_ref, o_ref, *,
                    n_rows, n_head_tiles, has_tail, use_mxu, use_bf16):
    def head_tile():
        if use_mxu:
            if use_bf16:
                # v7x MXU has no int mode; single-pass bf16 beats multi-pass f32.
                x = x_ref[...].astype(jnp.bfloat16)
                w = w_ref[...].astype(jnp.bfloat16)   # ternary weights exact in bf16
            else:
                x = x_ref[...]
                w = w_ref[...].astype(jnp.float32)    # exact
            acc = jnp.dot(x, w, preferred_element_type=jnp.float32)
        else:
            # VPU path for tiny contraction depth (out_features <= 8): unrolled
            # sum of (B,1)x(1,TN) broadcast-multiplies, no zero-padded MXU K.
            x = x_ref[...]
            w = w_ref[...].astype(jnp.float32)
            acc = x[:, 0:1] * w[0:1, :]
            for r in range(1, n_rows):
                acc = acc + x[:, r:r + 1] * w[r:r + 1, :]
        o_ref[...] = (acc + b_ref[...]).astype(o_ref.dtype)

    if has_tail:
        j = pl.program_id(1)

        @pl.when(j < n_head_tiles)
        def _():
            head_tile()

        @pl.when(j >= n_head_tiles)
        def _():
            # Zero-weight columns of the reference's unpacked matrix: bias only.
            o_ref[...] = jnp.broadcast_to(b_ref[...], o_ref.shape).astype(o_ref.dtype)
    else:
        head_tile()


# ----------------------------------------------------------------------------
# One-time weight preparation (hoisted out of the forward).
# ----------------------------------------------------------------------------
def prepare_qlinear(weight, bias, *, tn_cap=4096, bm=256):
    out_f, in_f = weight.shape
    if in_f < out_f:
        raise ValueError("reference forward reads x[:, :out_features]; "
                         "requires in_features >= out_features")
    C_total = out_f * in_f * 4                  # reference quirk: row_length = weight.numel()
    if out_f not in (1, C_total):
        raise ValueError(
            "the reference's final `+ bias` broadcasts (out_features,) against "
            "(batch, out_features*in_features*4); only out_features == 1 is torch-legal")

    head = _quantize_pack_unpack_head(weight)   # (out_f, C_head) int8: the only nonzero columns
    R, C_head = head.shape                      # R == out_f (rows of W hit by x)

    tn_cap = max(128, _round_up(tn_cap, 128))
    bm = max(8, _round_up(bm, 8))

    # Column tile: whole 128-padded output in one tile when it fits tn_cap,
    # otherwise balanced 128-multiples.  Multiple grid steps (and hence v7x
    # cross-core sharding) only appear once the output exceeds tn_cap columns.
    C_out128 = _round_up(C_total, 128)
    n_c_tiles = -(-C_out128 // tn_cap)
    tn = _round_up(-(-C_out128 // n_c_tiles), 128)
    C_out_p = n_c_tiles * tn

    Kp = _round_up(R, 32)                       # int8 sublane tile
    Cp_head = _round_up(C_head, tn)             # head columns padded to the tile
    # Zero padding (K rows beyond R, head columns beyond C_head) is load-bearing:
    # it makes padded contraction exact and the head/tail boundary tile decode
    # to plain bias.
    w_p = jnp.zeros((Kp, Cp_head), jnp.int8).at[:R, :C_head].set(head)

    # Bias broadcast identical to torch: (out_f,) vs (batch, C_total).
    bias_full = jnp.broadcast_to(bias.astype(jnp.float32), (C_total,))
    b_p = jnp.zeros((1, C_out_p), jnp.float32).at[0, :C_total].set(bias_full)

    meta = dict(R=R, C_head=C_head, C_total=C_total, tn=tn, bm=bm)
    return w_p, b_p, meta


# ----------------------------------------------------------------------------
# Jitted forward: one pallas_call produces the full (batch, C_total) output,
# bias-only tail included; at most a cheap de-pad slice afterwards.
# ----------------------------------------------------------------------------
@functools.partial(jax.jit,
                   static_argnames=("R", "C_head", "C_total", "tn", "bm",
                                    "use_bf16", "out_dtype"))
def qlinear_apply(x, w_p, b_p, *, R, C_head, C_total, tn, bm,
                  use_bf16=False, out_dtype=jnp.float32):
    batch = x.shape[0]
    Kp, Cp_head = w_p.shape
    C_out_p = b_p.shape[1]
    n_head_tiles = Cp_head // tn
    n_c_tiles = C_out_p // tn
    has_tail = n_c_tiles > n_head_tiles

    # Batch tiling: full-extent (unpadded) batch block while small; tile + pad
    # once batch exceeds bm so the f32 output tile stays within the VMEM budget
    # (v7x has only 64 MiB physical) and v7x gets a second parallel axis.
    if batch <= bm:
        B_pad, b_blk, n_b_tiles = batch, batch, 1
    else:
        B_pad = _round_up(batch, bm)
        b_blk, n_b_tiles = bm, B_pad // bm

    x_p = jnp.zeros((B_pad, Kp), jnp.float32).at[:batch, :R].set(
        x[:, :R].astype(jnp.float32))

    use_mxu = R > 8
    kernel = functools.partial(
        _qlinear_kernel, n_rows=R, n_head_tiles=n_head_tiles,
        has_tail=has_tail, use_mxu=use_mxu, use_bf16=use_bf16)

    if has_tail:
        # Clamp to the last head tile: consecutive tail steps keep the same
        # block index, so Pallas skips the redundant weight DMA.
        w_index_map = lambda b, j: (0, jnp.minimum(j, n_head_tiles - 1))
    else:
        w_index_map = lambda b, j: (0, j)

    # Explicit VMEM budget: double-buffered weight/bias/out tiles + x block,
    # plus headroom; never below the default scoped limit, well under v7x's
    # 64 MiB physical.
    vmem_bytes = 2 * (Kp * tn + 4 * tn + 4 * b_blk * tn + 4 * b_blk * Kp) + (4 << 20)
    vmem_bytes = min(max(vmem_bytes, 32 << 20), 48 << 20)

    flops = 2 * B_pad * Kp * Cp_head
    bytes_accessed = Kp * Cp_head + 4 * B_pad * Kp + 4 * C_out_p + 4 * B_pad * C_out_p

    out_p = pl.pallas_call(
        kernel,
        out_shape=jax.ShapeDtypeStruct((B_pad, C_out_p), out_dtype),
        grid_spec=pltpu.PrefetchScalarGridSpec(
            num_scalar_prefetch=0,
            grid=(n_b_tiles, n_c_tiles),
            in_specs=[
                pl.BlockSpec((b_blk, Kp), lambda b, j: (b, 0)),   # x: one DMA per batch tile
                pl.BlockSpec((Kp, tn), w_index_map),              # int8 weight head tile
                pl.BlockSpec((1, tn), lambda b, j: (0, j)),       # bias column tile
            ],
            out_specs=pl.BlockSpec((b_blk, tn), lambda b, j: (b, j)),
        ),
        compiler_params=pltpu.CompilerParams(
            dimension_semantics=("parallel", "parallel"),
            vmem_limit_bytes=vmem_bytes),
        cost_estimate=pl.CostEstimate(
            flops=flops, transcendentals=0, bytes_accessed=bytes_accessed),
    )(x_p, w_p, b_p)

    if B_pad != batch or C_out_p != C_total:
        out_p = out_p[:batch, :C_total]
    return out_p


# ----------------------------------------------------------------------------
# Pure-JAX reference of the PyTorch forward (correctness check).
# ----------------------------------------------------------------------------
def reference_forward(x, weight, bias):
    out_f, in_f = weight.shape
    C_total = out_f * in_f * 4
    head = _quantize_pack_unpack_head(weight)
    unpacked = jnp.zeros((out_f, C_total), jnp.int8).at[:, : head.shape[1]].set(head)
    out = x[:, :out_f].astype(jnp.float32) @ unpacked.astype(jnp.float32)
    return out + jnp.broadcast_to(bias.astype(jnp.float32), (C_total,))


if __name__ == "__main__":
    # out_features == 1 is the only shape for which the torch module's final
    # bias broadcast is legal (see header comment).
    in_features, out_features, batch = 64, 1, 8

    key = jax.random.PRNGKey(0)
    kw, kx, kx2 = jax.random.split(key, 3)
    weight = jax.random.normal(kw, (out_features, in_features), dtype=jnp.float32)
    bias = jnp.zeros((out_features,), dtype=jnp.float32)       # module inits bias = 0
    x = jax.random.normal(kx, (batch, in_features), dtype=jnp.float32)
    ref = reference_forward(x, weight, bias)

    # --- default config: whole output in a single column tile, resident batch ---
    w_p, b_p, meta = prepare_qlinear(weight, bias)             # prepare once, apply many
    out = jax.block_until_ready(qlinear_apply(x, w_p, b_p, **meta))
    assert out.shape == (batch, out_features * in_features * 4)
    assert out.dtype == jnp.float32
    assert jnp.allclose(out, ref, atol=1e-5, rtol=1e-5), "mismatch vs reference (single-tile path)"

    # --- small-tile config: exercises multi-tile grid, in-kernel bias-only tail
    #     tiles (pl.when + clamped weight index_map) and the batch grid axis ---
    batch2 = 16
    x2 = jax.random.normal(kx2, (batch2, in_features), dtype=jnp.float32)
    ref2 = reference_forward(x2, weight, bias)
    w_p2, b_p2, meta2 = prepare_qlinear(weight, bias, tn_cap=128, bm=8)
    out2 = jax.block_until_ready(qlinear_apply(x2, w_p2, b_p2, **meta2))
    assert out2.shape == (batch2, out_features * in_features * 4)
    assert jnp.allclose(out2, ref2, atol=1e-5, rtol=1e-5), "mismatch vs reference (tiled path)"

    print("KERNEL_OK")
</pallas_src>

<mosaic_0001>
module attributes {stable_mosaic.version = 11 : i64} {
  func.func @_qlinear_kernel(%arg0: i32, %arg1: i32, %arg2: memref<8x32xf32, #tpu.memory_space<vmem>>, %arg3: memref<32x256xi8, #tpu.memory_space<vmem>>, %arg4: memref<1x256xf32, #tpu.memory_space<vmem>>, %arg5: memref<8x256xf32, #tpu.memory_space<vmem>>) attributes {dimension_semantics = [#tpu.dimension_semantics<parallel>, #tpu.dimension_semantics<parallel>], iteration_bounds = array<i64: 1, 1>, scalar_prefetch = 0 : i64, scratch_operands = 0 : i64, tpu.core_type = #tpu.core_type<tc>, window_params = [{transform_indices = @transform_0, window_bounds = array<i64: 8, 32>}, {transform_indices = @transform_1, window_bounds = array<i64: 32, 256>}, {transform_indices = @transform_2, window_bounds = array<i64: 1, 256>}, {transform_indices = @transform_3, window_bounds = array<i64: 8, 256>}]} {
    %c0 = arith.constant 0 : index
    %c0_0 = arith.constant 0 : index
    %0 = vector.load %arg2[%c0, %c0_0] : memref<8x32xf32, #tpu.memory_space<vmem>>, vector<8x32xf32>
    %c0_1 = arith.constant 0 : index
    %c0_2 = arith.constant 0 : index
    %1 = vector.load %arg3[%c0_1, %c0_2] : memref<32x256xi8, #tpu.memory_space<vmem>>, vector<32x256xi8>
    %2 = arith.sitofp %1 : vector<32x256xi8> to vector<32x256xf32>
    %3 = vector.extract_strided_slice %0 {offsets = [0, 0], sizes = [8, 1], strides = [1, 1]} : vector<8x32xf32> to vector<8x1xf32>
    %4 = vector.extract_strided_slice %2 {offsets = [0, 0], sizes = [1, 256], strides = [1, 1]} : vector<32x256xf32> to vector<1x256xf32>
    %5 = vector.broadcast %3 : vector<8x1xf32> to vector<8x256xf32>
    %6 = vector.broadcast %4 : vector<1x256xf32> to vector<8x256xf32>
    %7 = arith.mulf %5, %6 : vector<8x256xf32>
    %c0_3 = arith.constant 0 : index
    %c0_4 = arith.constant 0 : index
    %8 = vector.load %arg4[%c0_3, %c0_4] : memref<1x256xf32, #tpu.memory_space<vmem>>, vector<1x256xf32>
    %9 = vector.broadcast %8 : vector<1x256xf32> to vector<8x256xf32>
    %10 = arith.addf %7, %9 : vector<8x256xf32>
    %c0_5 = arith.constant 0 : index
    %c0_6 = arith.constant 0 : index
    %11 = vector.load %arg5[%c0_5, %c0_6] : memref<8x256xf32, #tpu.memory_space<vmem>>, vector<8x256xf32>
    tpu.vector_store %arg5[%c0_5, %c0_6], %10 {strides = array<i32>} : memref<8x256xf32, #tpu.memory_space<vmem>>, vector<8x256xf32>,
    return
  }
  func.func @transform_0(%arg0: i32, %arg1: i32) -> (i32, i32) {
    %c0_i32 = arith.constant 0 : i32
    %c0_i32_0 = arith.constant 0 : i32
    return %arg0, %c0_i32 : i32, i32
  }
  func.func @transform_1(%arg0: i32, %arg1: i32) -> (i32, i32) {
    %c0_i32 = arith.constant 0 : i32
    %c0_i32_0 = arith.constant 0 : i32
    return %c0_i32, %arg1 : i32, i32
  }
  func.func @transform_2(%arg0: i32, %arg1: i32) -> (i32, i32) {
    %c0_i32 = arith.constant 0 : i32
    %c0_i32_0 = arith.constant 0 : i32
    return %c0_i32, %arg1 : i32, i32
  }
  func.func @transform_3(%arg0: i32, %arg1: i32) -> (i32, i32) {
    %c0_i32 = arith.constant 0 : i32
    return %arg0, %arg1 : i32, i32
  }
}

</mosaic_0001>

<bundles_post_ra>
// kernel: qlinear_apply.1
= control target key start
LH: loop header
LB: loop body
LE: loop exit
PB: predicated region body
PF: predicated region fallthrough
CT: control target
= control target key end

     0   :  { %v86_v1 = vmov 0   ;;  %s123_s0 = inlined_call_operand.vmem [shape: f32[8,32], index: 0, kind: input, shape index: {}]   ;;  %s124_s1 = inlined_call_operand.vmem [shape: s8[32,256], index: 1, kind: input, shape index: {}]   ;;  %s125_s2 = inlined_call_operand.vmem [shape: f32[1,256], index: 2, kind: input, shape index: {}]   ;;  %s126_s3 = inlined_call_operand.hbm [shape: f32[8,256], index: 3, kind: output, shape index: {}]  }
   0x1   :  { %v15_v0 = vld [vmem:[%s123_s0] sm:$0xff]  ;;  %59 = vset.pattern.permute.xlu0 %v86_v1 }
   0x2   :  { %8 = vsyncpa [#allocation3], 0  ;;  %24 = vperm.xlu0 %59, %v15_v0   ;;  %v16_v2 = vld [vmem:[%s124_s1] sm:$0x3]  ;;  %v17_v3 = vld [vmem:[%s124_s1 + $0x8] sm:$0x3] }
   0x3   :  { %v18_v4 = vunpack.c.0.s8 %v16_v2  ;;  %v19_v5 = vunpack.c.0.s8 %v17_v3  ;;  %v31_v8 = vld [vmem:[%s125_s2] sm:$0x3]  ;;  %s87_s0 = smov [#allocation2]   ;;  %s48_s1 = sshll.u32 %s126_s3, 4  ;;  %s49_s1 = int_to_ptr.hbm [resolvable:$true] %s48_s1 }
   0x4   :  { %v33_v11 = vperm.slane %v31_v8, 0  ;;  %v34_v12 = vperm.slane %v31_v8, 1  ;;  %s46_s20 = sshll.u32 %s87_s0, 4  ;;  %s47_s20 = int_to_ptr.vmem [resolvable:$true] %s46_s20 }
   0x5   :  { %v20_v6 = vcvt.s32.f32 %v18_v4  ;;  %v21_v7 = vcvt.s32.f32 %v19_v5 }
   0x7   :  { %v27_v9 = vperm.slane %v20_v6, 0  ;;  %v28_v10 = vperm.slane %v21_v7, 0 }
  0x74   :  { %v25_v13 = vpop.permute.xlu0 %24 }
  0x75   :  { %v29_v14 = vmul.f32 %v27_v9, %v25_v13  ;;  %v30_v15 = vmul.f32 %v28_v10, %v25_v13 }
  0x77   :  { %v37_v16 = vadd.f32 %v33_v11, %v29_v14  ;;  %v38_v17 = vadd.f32 %v34_v12, %v30_v15 }
  0x79   :  { %39 = vst [vmem:[#allocation2] sm:$0xff] %v37_v16 }
  0x7a   :  { %40 = vst [vmem:[#allocation2 + $0x8] sm:$0xff] %v38_v17 }
  0x7b   :  { %51 = dma.vmem_to_hbm [thread:$0]  %s47_s20, 256, %s49_s1, [#allocation3]  }
  0x7c   :  { %84 = dma.done.wait [#allocation3], 256  }
  0x7d   :  { %85 = vsyncadd [#allocation3], 4294967040 }
  0x7e   :  { %56 = vsyncpa [#allocation3], 1 }

</bundles_post_ra>
